<compile_context>
chip_gen: v5e
topology: v5e:2x2
jax: 0.10.0
libtpu: 0.0.40
codegen_flags: <defaults>
</compile_context>

<pallas_src>
import jax
import jax.numpy as jnp
from jax.experimental import pallas as pl
from jax.experimental.pallas import tpu as pltpu


def _round_up(x, m):
    return ((x + m - 1) // m) * m


def _patch_embed_kernel(x_ref, w_ref, b_ref, o_ref):
    # x_ref: (tm, K) bf16 patch features
    # w_ref: (K, Np) bf16 projection weight (resident: constant index_map)
    # b_ref: (1, Np) f32 bias
    acc = jnp.dot(x_ref[...], w_ref[...], preferred_element_type=jnp.float32)
    o_ref[...] = (acc + b_ref[...]).astype(o_ref.dtype)


def patch_embedding(x, weight, bias, patch_size, *, tm_max=512):
    """x: (B, C, H, W) NCHW. weight: (E, C, P, P). bias: (E,). Returns (B, n_patches, E)."""
    B, C, H, W = x.shape
    E = weight.shape[0]
    P = patch_size
    nh, nw = H // P, W // P
    n_patches = nh * nw
    out_dtype = x.dtype

    # --- glue: cast to bf16, then extract non-overlapping patches (c,kh,kw) order ---
    xb = x.astype(jnp.bfloat16)
    xp = xb.reshape(B, C, nh, P, nw, P)             # (B,C,nh,P,nw,P)
    xp = xp.transpose(0, 2, 4, 1, 3, 5)             # (B,nh,nw,C,P,P)
    xp = xp.reshape(B * n_patches, C * P * P)       # (M, K) bf16

    M, K = xp.shape
    N_pad = _round_up(E, 128)                       # lane-dense output stores

    # weight (E,C,P,P) -> (K, N_pad) bf16 ; bias -> (1, N_pad) f32
    wmat = weight.reshape(E, K).T.astype(jnp.bfloat16)
    bvec = bias.reshape(1, E).astype(jnp.float32)
    if N_pad != E:
        wmat = jnp.pad(wmat, ((0, 0), (0, N_pad - E)))
        bvec = jnp.pad(bvec, ((0, 0), (0, N_pad - E)))

    # --- row tile: as large as VMEM allows (double-buffered bf16 x/out + weight) ---
    tm = min(tm_max, _round_up(M, 16))              # 16 = bf16 sublane pack
    tm = _round_up(tm, 16)
    vmem_budget = 24 << 20                          # fits default scoped VMEM everywhere
    while tm > 16:
        need = 2 * (2 * tm * K            # x tile, double-buffered, bf16
                    + 2 * K * N_pad       # weight (allocated 2x even if resident)
                    + 4 * tm * N_pad)     # out tile, double-buffered, f32
        if need <= vmem_budget:
            break
        tm //= 2
    tm = max(16, _round_up(tm, 16))

    M_pad = _round_up(M, tm)
    if M_pad != M:
        xp = jnp.pad(xp, ((0, M_pad - M), (0, 0)))

    grid = (M_pad // tm,)

    cost = pl.CostEstimate(
        flops=2 * M_pad * K * N_pad,
        transcendentals=0,
        bytes_accessed=2 * (M_pad * K + K * N_pad)
        + jnp.dtype(out_dtype).itemsize * M_pad * N_pad,
    )

    out = pl.pallas_call(
        _patch_embed_kernel,
        out_shape=jax.ShapeDtypeStruct((M_pad, N_pad), out_dtype),
        grid_spec=pltpu.PrefetchScalarGridSpec(
            num_scalar_prefetch=0,
            grid=grid,
            in_specs=[
                pl.BlockSpec((tm, K), lambda i: (i, 0)),
                pl.BlockSpec((K, N_pad), lambda i: (0, 0)),
                pl.BlockSpec((1, N_pad), lambda i: (0, 0)),
            ],
            out_specs=pl.BlockSpec((tm, N_pad), lambda i: (i, 0)),
        ),
        compiler_params=pltpu.CompilerParams(
            dimension_semantics=("parallel",)),
        cost_estimate=cost,
    )(xp, wmat, bvec)

    return out[:M, :E].reshape(B, n_patches, E)


if __name__ == "__main__":
    # Small shapes consistent with the module: img_size=16, patch_size=4,
    # in_chan=4, embed_dim=32, batch=2 -> n_patches = (16//4)**2 = 16.
    B, C, IMG, P, E = 2, 4, 16, 4, 32

    key = jax.random.PRNGKey(0)
    kx, kw, kb = jax.random.split(key, 3)
    x = jax.random.normal(kx, (B, C, IMG, IMG), dtype=jnp.float32)
    weight = jax.random.normal(kw, (E, C, P, P), dtype=jnp.float32) * 0.02
    bias = jax.random.normal(kb, (E,), dtype=jnp.float32) * 0.02

    out = patch_embedding(x, weight, bias, P)
    out = jax.block_until_ready(out)

    # reference: stride==kernel conv == patchify + linear, using the same bf16
    # operand rounding (f32 accumulation) as the kernel.
    nh = nw = IMG // P
    xp_ref = (x.reshape(B, C, nh, P, nw, P)
                .transpose(0, 2, 4, 1, 3, 5)
                .reshape(B, nh * nw, -1)
                .astype(jnp.bfloat16).astype(jnp.float32))
    w_ref = weight.reshape(E, -1).astype(jnp.bfloat16).astype(jnp.float32)
    ref = jnp.einsum('bpk,ek->bpe', xp_ref, w_ref) + bias

    assert out.shape == (B, nh * nw, E)
    assert jnp.allclose(out, ref, atol=1e-3, rtol=1e-3)
    print("KERNEL_OK")
</pallas_src>

<mosaic_0001>
module attributes {stable_mosaic.version = 11 : i64} {
  func.func @_patch_embed_kernel(%arg0: i32, %arg1: memref<32x64xbf16, #tpu.memory_space<vmem>>, %arg2: memref<64x128xbf16, #tpu.memory_space<vmem>>, %arg3: memref<1x128xf32, #tpu.memory_space<vmem>>, %arg4: memref<32x128xf32, #tpu.memory_space<vmem>>) attributes {dimension_semantics = [#tpu.dimension_semantics<parallel>], iteration_bounds = array<i64: 1>, scalar_prefetch = 0 : i64, scratch_operands = 0 : i64, tpu.core_type = #tpu.core_type<tc>, window_params = [{transform_indices = @transform_0, window_bounds = array<i64: 32, 64>}, {pipeline_mode = #tpu.pipeline_mode<synchronous>, transform_indices = @transform_1, window_bounds = array<i64: 64, 128>}, {pipeline_mode = #tpu.pipeline_mode<synchronous>, transform_indices = @transform_2, window_bounds = array<i64: 1, 128>}, {transform_indices = @transform_3, window_bounds = array<i64: 32, 128>}]} {
    %c0 = arith.constant 0 : index
    %c0_0 = arith.constant 0 : index
    %0 = vector.load %arg1[%c0, %c0_0] : memref<32x64xbf16, #tpu.memory_space<vmem>>, vector<32x64xbf16>
    %c0_1 = arith.constant 0 : index
    %c0_2 = arith.constant 0 : index
    %1 = vector.load %arg2[%c0_1, %c0_2] : memref<64x128xbf16, #tpu.memory_space<vmem>>, vector<64x128xbf16>
    %cst = arith.constant dense<0.000000e+00> : vector<32x128xf32>
    %2 = tpu.matmul %0, %1, %cst {dimension_numbers = #tpu.dot_dimension_numbers<[1], [0], [0], [1], [0, 0, 1, 1], [], []>} : vector<32x64xbf16>, vector<64x128xbf16>, vector<32x128xf32> -> vector<32x128xf32>
    %c0_3 = arith.constant 0 : index
    %c0_4 = arith.constant 0 : index
    %3 = vector.load %arg3[%c0_3, %c0_4] : memref<1x128xf32, #tpu.memory_space<vmem>>, vector<1x128xf32>
    %4 = vector.broadcast %3 : vector<1x128xf32> to vector<32x128xf32>
    %5 = arith.addf %2, %4 : vector<32x128xf32>
    %c0_5 = arith.constant 0 : index
    %c0_6 = arith.constant 0 : index
    %6 = vector.load %arg4[%c0_5, %c0_6] : memref<32x128xf32, #tpu.memory_space<vmem>>, vector<32x128xf32>
    tpu.vector_store %arg4[%c0_5, %c0_6], %5 {strides = array<i32>} : memref<32x128xf32, #tpu.memory_space<vmem>>, vector<32x128xf32>,
    return
  }
  func.func @transform_0(%arg0: i32) -> (i32, i32) {
    %c0_i32 = arith.constant 0 : i32
    %c0_i32_0 = arith.constant 0 : i32
    return %arg0, %c0_i32 : i32, i32
  }
  func.func @transform_1(%arg0: i32) -> (i32, i32) {
    %c0_i32 = arith.constant 0 : i32
    %c0_i32_0 = arith.constant 0 : i32
    %c0_i32_1 = arith.constant 0 : i32
    return %c0_i32, %c0_i32_0 : i32, i32
  }
  func.func @transform_2(%arg0: i32) -> (i32, i32) {
    %c0_i32 = arith.constant 0 : i32
    %c0_i32_0 = arith.constant 0 : i32
    %c0_i32_1 = arith.constant 0 : i32
    return %c0_i32, %c0_i32_0 : i32, i32
  }
  func.func @transform_3(%arg0: i32) -> (i32, i32) {
    %c0_i32 = arith.constant 0 : i32
    %c0_i32_0 = arith.constant 0 : i32
    return %arg0, %c0_i32 : i32, i32
  }
}

</mosaic_0001>

<bundles_post_ra>
// kernel: tpu_custom_call.1
= control target key start
LH: loop header
LB: loop body
LE: loop exit
PB: predicated region body
PF: predicated region fallthrough
CT: control target
= control target key end

     0   :  { %8 = vsyncpa [#allocation3], 0  ;;  %s309_s0 = inlined_call_operand.hbm [shape: bf16[32,64], index: 0, kind: input, shape index: {}]   ;;  %s310_s1 = inlined_call_operand.hbm [shape: bf16[64,128], index: 1, kind: input, shape index: {}]   ;;  %s311_s2 = inlined_call_operand.vmem [shape: f32[1,128], index: 2, kind: input, shape index: {}]   ;;  %s312_s3 = inlined_call_operand.hbm [shape: f32[32,128], index: 3, kind: output, shape index: {}]  }
   0x1   :  { %9 = vsyncpa [#allocation6], 0 }
   0x2   :  { %10 = vsyncpa [#allocation4], 0  ;;  %s15_s14 = sshll.u32 %s309_s0, 4  ;;  %s270_s15 = smov [#allocation2]   ;;  %s16_s14 = int_to_ptr.hbm [resolvable:$true] %s15_s14 }
   0x3   :  { %s17_s16 = sshll.u32 %s270_s15, 4  ;;  %s28_s19 = sshll.u32 %s310_s1, 4  ;;  %s18_s16 = int_to_ptr.vmem [resolvable:$true] %s17_s16  ;;  %s29_s19 = int_to_ptr.hbm [resolvable:$true] %s28_s19 }
   0x4   :  { %s271_s20 = smov 64   ;;  %s272_s21 = smov 4  }
   0x5   :  { %23 = dma.hbm_to_vmem [thread:$0]  %s16_s14, 256, %s18_s16, [#allocation3], %s271_s20, %s271_s20, %s272_s21  }
   0x6   :  { %s273_s22 = smov [#allocation5]  }
   0x7   :  { %s30_s23 = sshll.u32 %s273_s22, 4  ;;  %s31_s23 = int_to_ptr.vmem [resolvable:$true] %s30_s23 }
   0x8   :  { %36 = dma.hbm_to_vmem [thread:$0]  %s29_s19, 512, %s31_s23, [#allocation6], %s271_s20, %s271_s20, %s272_s21  }
   0x9   :  { %264 = dma.done.wait [#allocation3], 256  }
   0xa   :  { %265 = vsyncadd [#allocation3], 4294967040 }
   0xb   :  { %266 = dma.done.wait [#allocation6], 512  }
   0xc   :  { %267 = vsyncadd [#allocation6], 4294966784  ;;  %v179_v0 = vld [vmem:[#allocation5 + $0x18] sm:$0xff]  ;;  %v178_v1 = vld [vmem:[#allocation5 + $0x10] sm:$0xff]  ;;  %vm98_vm0 = vcmask 523264   ;;  %s274_s24 = smov [#allocation7]  }
   0xd   :  { %109 = vmatpush.bf16.msra.mxu0 %v179_v0  ;;  %180 = vmatpush.bf16.msra.mxu1 %v179_v0  ;;  %v177_v2 = vld [vmem:[#allocation5 + $0x8] sm:$0xff]  ;;  %v176_v3 = vld [vmem:[#allocation5] sm:$0xff]  ;;  %v174_v4 = vld [vmem:[#allocation2] sm:$0xff]  ;;  %s132_s25 = sshll.u32 %s274_s24, 4  ;;  %s134_s28 = sshll.u32 %s312_s3, 4  ;;  %s133_s25 = int_to_ptr.vmem [resolvable:$true] %s132_s25  ;;  %s135_s28 = int_to_ptr.hbm [resolvable:$true] %s134_s28 }
   0xe   :  { %v175_v5 = vld [vmem:[#allocation2 + $0x8] sm:$0xff]  ;;  %v191_v6 = vld [vmem:[%s311_s2] ss:$0 sm:$0xff]  ;;  %s275_s2 = smov 128   ;;  %s276_s29 = smov 8  }
  0x11   :  { %110 = vmatpush.bf16.msra.mxu0 %v178_v1  ;;  %181 = vmatpush.bf16.msra.mxu1 %v178_v1 }
  0x15   :  { %111 = vmatpush.bf16.msra.mxu0 %v177_v2  ;;  %182 = vmatpush.bf16.msra.mxu1 %v177_v2 }
  0x19   :  { %112 = vmatpush.bf16.msra.mxu0 %v176_v3  ;;  %183 = vmatpush.bf16.msra.mxu1 %v176_v3 }
  0x1c   :  { %172 = vmatmul.msk.bf16.vlgmr.msra.gmra.mxu0 %vm98_vm0, %v174_v4  ;;  %173 = vmatmul.msk.bf16.vlgmr.msra.gmra.mxu1 %vm98_vm0, %v175_v5 }
  0x99   :  { %v114_v7 = vpop.f32.mrf.mxu0  ;;  %v119_v8 = vpop.f32.mrf.mxu1 }
  0x9a   :  { %v115_v9 = vadd.f32 %v191_v6, %v114_v7  ;;  %v120_v10 = vadd.f32 %v191_v6, %v119_v8 }
  0x9c   :  { %124 = vst [vmem:[#allocation7] sm:$0xff] %v115_v9 }
  0x9d   :  { %126 = vst [vmem:[#allocation7 + $0x10] sm:$0xff] %v120_v10 }
  0xa1   :  { %v116_v11 = vpop.f32.mrf.mxu0  ;;  %v121_v12 = vpop.f32.mrf.mxu1 }
  0xa2   :  { %v117_v13 = vadd.f32 %v191_v6, %v116_v11  ;;  %v122_v14 = vadd.f32 %v191_v6, %v121_v12 }
  0xa4   :  { %125 = vst [vmem:[#allocation7 + $0x8] sm:$0xff] %v117_v13 }
  0xa5   :  { %127 = vst [vmem:[#allocation7 + $0x18] sm:$0xff] %v122_v14 }
  0xa6   :  { %140 = dma.vmem_to_hbm [thread:$0]  %s133_s25, 512, %s135_s28, [#allocation4], %s275_s2, %s275_s2, %s276_s29  }
  0xa7   :  { %268 = dma.done.wait [#allocation4], 512  }
  0xa8   :  { %269 = vsyncadd [#allocation4], 4294966784 }
  0xa9   :  { %145 = vsyncpa [#allocation3], 1 }
  0xaa   :  { %146 = vsyncpa [#allocation6], 1 }
  0xab   :  { %147 = vsyncpa [#allocation4], 1 }

</bundles_post_ra>
